<compile_context>
chip_gen: v7x
topology: tpu7x:2x2x1
jax: 0.10.0
libtpu: 0.0.40
codegen_flags: <defaults>
</compile_context>

<pallas_src>
import math

import jax
import jax.numpy as jnp
from jax import lax
from jax.experimental import pallas as pl
from jax.experimental.pallas import tpu as pltpu


def _cdiv(a, b):
    return (a + b - 1) // b


def _round_up(x, m):
    return _cdiv(x, m) * m


def _pick_bk(kp, cap):
    """Largest multiple of 128 that divides kp (kp is a multiple of 128) and is <= cap."""
    cap = max(128, (min(cap, kp) // 128) * 128)
    if kp <= cap:
        return kp
    for cand in range(cap, 127, -128):
        if kp % cand == 0:
            return cand
    return 128


def _vmem_est(bm, bn, bk, xb, wb, ob, bias_b, use_scratch):
    # Double-buffered input/output tiles (+ bias tile) + optional f32 accumulator.
    est = 2 * (bm * bk * xb + bn * bk * wb + bm * bn * ob)
    if bias_b:
        est += 2 * bn * bias_b
    if use_scratch:
        est += bm * bn * 4
    return est


def _make_linear_kernel(has_bias, acc_in_out):
    """Kernel body. Ref order: x, w[, b], o[, acc]."""

    def kernel(*refs):
        if has_bias:
            x_ref, w_ref, b_ref = refs[0], refs[1], refs[2]
            o_ref = refs[3]
        else:
            x_ref, w_ref = refs[0], refs[1]
            b_ref = None
            o_ref = refs[2]
        acc_ref = o_ref if acc_in_out else refs[-1]

        k = pl.program_id(2)

        @pl.when(k == 0)
        def _init():
            if has_bias:
                # Initialise the accumulator with the bias -> no epilogue add.
                acc_ref[...] = jnp.broadcast_to(
                    b_ref[...].astype(jnp.float32), acc_ref.shape)
            else:
                acc_ref[...] = jnp.zeros_like(acc_ref)

        # x (bm, bk) contracted with w (bn, bk) on the last dims -> (bm, bn);
        # weight stays in its native (out_features, in_features) layout.
        acc_ref[...] += lax.dot_general(
            x_ref[...], w_ref[...],
            dimension_numbers=(((1,), (1,)), ((), ())),
            preferred_element_type=jnp.float32)

        if not acc_in_out:
            @pl.when(k == pl.num_programs(2) - 1)
            def _finalize():
                o_ref[...] = acc_ref[...].astype(o_ref.dtype)

    return kernel


def linear(x, weight, bias=None, *, block_m=512, block_n=1024, block_k=512,
           operand_dtype=None, out_dtype=None,
           vmem_budget_bytes=28 * 1024 * 1024):
    """y = x @ weight.T (+ bias), matching the PyTorch Linear module forward."""
    *lead, K = x.shape
    N, K_w = weight.shape
    assert K == K_w, (K, K_w)
    if bias is not None:
        assert bias.shape == (N,), bias.shape
    M = int(math.prod(lead)) if lead else 1
    out_dtype = jnp.dtype(x.dtype if out_dtype is None else out_dtype)

    x2 = x.reshape(M, K)

    # Small-problem bypass: padding K/N up to (8,128) tiles wastes most of the
    # MXU and the launch/pad overhead dominates microsecond-scale layers.
    if K < 128 or N < 128 or (M * N * K) < (1 << 20):
        y = lax.dot_general(x2, weight, (((1,), (1,)), ((), ())),
                            preferred_element_type=jnp.float32)
        if bias is not None:
            y = y + bias.astype(jnp.float32)
        return y.astype(out_dtype).reshape(*lead, N)

    w = weight
    if operand_dtype is not None:
        x2 = x2.astype(operand_dtype)
        w = w.astype(operand_dtype)
    xb = jnp.dtype(x2.dtype).itemsize
    wb = jnp.dtype(w.dtype).itemsize
    ob = out_dtype.itemsize
    bias_b = jnp.dtype(bias.dtype).itemsize if bias is not None else 0

    has_bias = bias is not None
    acc_in_out = out_dtype == jnp.dtype(jnp.float32)

    # ---- tile selection -----------------------------------------------------
    Kp = _round_up(K, 128)                 # reduction axis rounded up to 128
    bk = _pick_bk(Kp, block_k)             # always divides Kp
    bm = min(block_m, _round_up(M, 8))
    bn = min(block_n, _round_up(N, 128))

    # Shrink until the double-buffered working set fits the VMEM budget
    # (keeps the config safe on v7x's 64 MiB as well as v5e/v6e's 128 MiB).
    while _vmem_est(bm, bn, bk, xb, wb, ob, bias_b, not acc_in_out) > vmem_budget_bytes:
        if bn >= 512:
            bn = max(128, (bn // 2) // 128 * 128)
        elif bk > 256:
            bk = _pick_bk(Kp, bk // 2)
        elif bm > 64:
            bm = max(8, (bm // 2) // 8 * 8)
        elif bn > 128:
            bn = max(128, (bn // 2) // 128 * 128)
        elif bk > 128:
            bk = _pick_bk(Kp, bk // 2)
        elif bm > 8:
            bm = max(8, (bm // 2) // 8 * 8)
        else:
            break

    # Megacore / v7x: make sure there are >= 2 (M, N) output blocks so both
    # TensorCores get work from the "parallel" grid axes.
    if _cdiv(M, bm) * _cdiv(N, bn) < 2:
        if M >= 16:
            bm = _round_up(_cdiv(M, 2), 8)
        elif N > 128:
            bn = _round_up(_cdiv(N, 2), 128)

    # Zero-pad the reduction axis only (the accumulator must never see undefined
    # values); ragged M/N boundaries rely on partial blocks whose out-of-bounds
    # results are dropped on write.
    if Kp != K:
        x2 = jnp.pad(x2, ((0, 0), (0, Kp - K)))
        w = jnp.pad(w, ((0, 0), (0, Kp - K)))

    grid = (_cdiv(M, bm), _cdiv(N, bn), Kp // bk)

    in_specs = [
        pl.BlockSpec((bm, bk), lambda i, j, k: (i, k)),
        pl.BlockSpec((bn, bk), lambda i, j, k: (j, k)),
    ]
    inputs = [x2, w]
    if has_bias:
        in_specs.append(pl.BlockSpec((1, bn), lambda i, j, k: (0, j)))
        inputs.append(bias.reshape(1, N))

    scratch_shapes = [] if acc_in_out else [pltpu.VMEM((bm, bn), jnp.float32)]

    est = _vmem_est(bm, bn, bk, xb, wb, ob, bias_b, not acc_in_out)
    vmem_limit = int(min(64 * 1024 * 1024, max(32 * 1024 * 1024, est + (4 << 20))))

    out = pl.pallas_call(
        _make_linear_kernel(has_bias, acc_in_out),
        out_shape=jax.ShapeDtypeStruct((M, N), out_dtype),
        grid_spec=pltpu.PrefetchScalarGridSpec(
            num_scalar_prefetch=0,
            grid=grid,
            in_specs=in_specs,
            out_specs=pl.BlockSpec((bm, bn), lambda i, j, k: (i, j)),
            scratch_shapes=scratch_shapes),
        compiler_params=pltpu.CompilerParams(
            dimension_semantics=("parallel", "parallel", "arbitrary"),
            vmem_limit_bytes=vmem_limit),
    )(*inputs)

    return out.reshape(*lead, N)


if __name__ == "__main__":
    key = jax.random.PRNGKey(0)
    k1, k2, k3, k4, k5, k6 = jax.random.split(key, 6)

    def ref_linear(x, w, b):
        y = lax.dot_general(x, w, (((x.ndim - 1,), (1,)), ((), ())),
                            precision=lax.Precision.HIGHEST,
                            preferred_element_type=jnp.float32)
        return y if b is None else y + b

    # 1) Main case: exercises the tiled Pallas matmul path (aligned shapes).
    B, S, K, N = 2, 64, 256, 384
    x = jax.random.normal(k1, (B, S, K), dtype=jnp.float32)
    # kaiming_normal init: sqrt(1/fan_in) * randn (init_weight=1).
    weight = jnp.sqrt(1.0 / K) * jax.random.normal(k2, (N, K), dtype=jnp.float32)
    bias = jax.random.normal(k3, (N,), dtype=jnp.float32)  # nonzero to exercise bias path
    y = jax.block_until_ready(linear(x, weight, bias))
    assert y.shape == (B, S, N)
    err = jnp.max(jnp.abs(y - ref_linear(x, weight, bias)))
    assert err < 1e-2, f"pallas path mismatch, max err {err}"

    # 2) Ragged case: partial M/N blocks + K padded to 128, no bias.
    B2, S2, K2, N2 = 2, 45, 200, 320
    x2 = jax.random.normal(k4, (B2, S2, K2), dtype=jnp.float32)
    w2 = jnp.sqrt(1.0 / K2) * jax.random.normal(k5, (N2, K2), dtype=jnp.float32)
    y2 = jax.block_until_ready(linear(x2, w2, None))
    assert y2.shape == (B2, S2, N2)
    err2 = jnp.max(jnp.abs(y2 - ref_linear(x2, w2, None)))
    assert err2 < 1e-2, f"ragged pallas path mismatch, max err {err2}"

    # 3) Tiny case (small embedding-style Linear): jnp bypass, same semantics.
    B3, S3, K3, N3 = 2, 16, 32, 64
    x3 = jax.random.normal(k6, (B3, S3, K3), dtype=jnp.float32)
    w3 = jnp.sqrt(1.0 / K3) * jax.random.normal(k1, (N3, K3), dtype=jnp.float32)
    b3 = jax.random.normal(k2, (N3,), dtype=jnp.float32)
    y3 = jax.block_until_ready(linear(x3, w3, b3))
    assert y3.shape == (B3, S3, N3)
    err3 = jnp.max(jnp.abs(y3 - ref_linear(x3, w3, b3)))
    assert err3 < 1e-2, f"bypass mismatch, max err {err3}"

    print("KERNEL_OK")
</pallas_src>

<mosaic_0001>
module attributes {stable_mosaic.version = 11 : i64} {
  func.func @kernel(%arg0: i32, %arg1: i32, %arg2: i32, %arg3: memref<64x256xf32, #tpu.memory_space<vmem>>, %arg4: memref<384x256xf32, #tpu.memory_space<vmem>>, %arg5: memref<1x384xf32, #tpu.memory_space<vmem>>, %arg6: memref<64x384xf32, #tpu.memory_space<vmem>>) attributes {dimension_semantics = [#tpu.dimension_semantics<parallel>, #tpu.dimension_semantics<parallel>, #tpu.dimension_semantics<arbitrary>], iteration_bounds = array<i64: 2, 1, 1>, scalar_prefetch = 0 : i64, scratch_operands = 0 : i64, tpu.core_type = #tpu.core_type<tc>, window_params = [{transform_indices = @transform_0, window_bounds = array<i64: 64, 256>}, {transform_indices = @transform_1, window_bounds = array<i64: 384, 256>}, {transform_indices = @transform_2, window_bounds = array<i64: 1, 384>}, {transform_indices = @transform_3, window_bounds = array<i64: 64, 384>}]} {
    %c0_i32 = arith.constant 0 : i32
    %0 = arith.cmpi eq, %arg2, %c0_i32 : i32
    %1 = arith.extui %0 : i1 to i32
    %c0_i32_0 = arith.constant 0 : i32
    %2 = arith.cmpi ne, %1, %c0_i32_0 : i32
    scf.if %2 {
      %c0_8 = arith.constant 0 : index
      %c0_9 = arith.constant 0 : index
      %9 = vector.load %arg5[%c0_8, %c0_9] : memref<1x384xf32, #tpu.memory_space<vmem>>, vector<1x384xf32>
      %10 = vector.shape_cast %9 : vector<1x384xf32> to vector<1x384xf32>
      %11 = vector.broadcast %10 : vector<1x384xf32> to vector<64x384xf32>
      %c0_10 = arith.constant 0 : index
      %c0_11 = arith.constant 0 : index
      %12 = vector.load %arg6[%c0_10, %c0_11] : memref<64x384xf32, #tpu.memory_space<vmem>>, vector<64x384xf32>
      tpu.vector_store %arg6[%c0_10, %c0_11], %11 {strides = array<i32>} : memref<64x384xf32, #tpu.memory_space<vmem>>, vector<64x384xf32>,
    } else {
    }
    %c0 = arith.constant 0 : index
    %c0_1 = arith.constant 0 : index
    %3 = vector.load %arg6[%c0, %c0_1] : memref<64x384xf32, #tpu.memory_space<vmem>>, vector<64x384xf32>
    %c0_2 = arith.constant 0 : index
    %c0_3 = arith.constant 0 : index
    %4 = vector.load %arg3[%c0_2, %c0_3] : memref<64x256xf32, #tpu.memory_space<vmem>>, vector<64x256xf32>
    %c0_4 = arith.constant 0 : index
    %c0_5 = arith.constant 0 : index
    %5 = vector.load %arg4[%c0_4, %c0_5] : memref<384x256xf32, #tpu.memory_space<vmem>>, vector<384x256xf32>
    %cst = arith.constant dense<0.000000e+00> : vector<64x384xf32>
    %6 = tpu.matmul %4, %5, %cst {dimension_numbers = #tpu.dot_dimension_numbers<[1], [1], [0], [0], [0, 0, 1, 0], [], []>} : vector<64x256xf32>, vector<384x256xf32>, vector<64x384xf32> -> vector<64x384xf32>
    %7 = arith.addf %3, %6 : vector<64x384xf32>
    %c0_6 = arith.constant 0 : index
    %c0_7 = arith.constant 0 : index
    %8 = vector.load %arg6[%c0_6, %c0_7] : memref<64x384xf32, #tpu.memory_space<vmem>>, vector<64x384xf32>
    tpu.vector_store %arg6[%c0_6, %c0_7], %7 {strides = array<i32>} : memref<64x384xf32, #tpu.memory_space<vmem>>, vector<64x384xf32>,
    return
  }
  func.func @transform_0(%arg0: i32, %arg1: i32, %arg2: i32) -> (i32, i32) {
    %c0_i32 = arith.constant 0 : i32
    return %arg0, %arg2 : i32, i32
  }
  func.func @transform_1(%arg0: i32, %arg1: i32, %arg2: i32) -> (i32, i32) {
    %c0_i32 = arith.constant 0 : i32
    return %arg1, %arg2 : i32, i32
  }
  func.func @transform_2(%arg0: i32, %arg1: i32, %arg2: i32) -> (i32, i32) {
    %c0_i32 = arith.constant 0 : i32
    %c0_i32_0 = arith.constant 0 : i32
    return %c0_i32, %arg1 : i32, i32
  }
  func.func @transform_3(%arg0: i32, %arg1: i32, %arg2: i32) -> (i32, i32) {
    %c0_i32 = arith.constant 0 : i32
    return %arg0, %arg1 : i32, i32
  }
}

</mosaic_0001>

<bundles_post_ra>
// kernel: tpu_custom_call.1
= control target key start
LH: loop header
LB: loop body
LE: loop exit
PB: predicated region body
PF: predicated region fallthrough
CT: control target
= control target key end

     0   :  { %8 = vsyncpa [#allocation3], 0  ;;  %s1507_s0 = inlined_call_operand.hbm [shape: f32[128,256], index: 0, kind: input, shape index: {}]   ;;  %s1508_s1 = inlined_call_operand.hbm [shape: f32[384,256], index: 1, kind: input, shape index: {}]   ;;  %s1509_s2 = inlined_call_operand.vmem [shape: f32[1,384], index: 2, kind: input, shape index: {}]   ;;  %s1510_s3 = inlined_call_operand.hbm [shape: f32[128,384], index: 3, kind: output, shape index: {}]  }
   0x1   :  { %10 = vsyncpa [#allocation3 + $0x1], 0 }
   0x2   :  { %11 = vsyncpa [#allocation6], 0 }
   0x3   :  { %12 = vsyncpa [#allocation4], 0 }
   0x4   :  { %14 = vsyncpa [#allocation4 + $0x1], 0  ;;  %s1217_s12 = smov 0   ;;  %s1219_s13 = smov 0  }
   0x5   :  { %s1221_s14 = smov 0   ;;  %s1223_s15 = smov 0  }
   0x6   :  { %s1225_s16 = smov 0   ;;  %s1227_s17 = smov 0  }
   0x7 LB: > { %s849_s18 = sadd.s32 4294967295, %s1188_s17   ;;  %s850_s19 = sadd.s32 4294967294, %s1188_s17   ;;  %s1188_s17 = sphi %s1227_s17, %s20_s17   ;;  %s1184_s16 = sphi %s1225_s16, %s1534_s16   ;;  %s1180_s15 = sphi %s1223_s15, %s1533_s15   ;;  %s1176_s14 = sphi %s1221_s14, %s1532_s14   ;;  %s1172_s13 = sphi %s1219_s13, %s1531_s13   ;;  %s1168_s12 = sphi %s1217_s12, %s1530_s12  }
   0x8   : > { %p61_p0 = scmp.ne.s32.totalorder %s1172_s13, %s1168_s12  ;;  %p1251_p1 = scmp.eq.s32.totalorder %s849_s18, 0 }
   0x9   : > { %p1255_p2 = scmp.eq.s32.totalorder %s849_s18, 1  ;;  %p147_p3 = scmp.eq.s32.totalorder %s850_s19, 1 }
   0xa   : > { %s1515_s20 = scalar_select %p1251_p1, 1, 0 }
   0xb   : > { %s1516_s21 = scalar_select %p1255_p2, 1, 0 }
   0xc   : > { %p1261_p4 = por %p1251_p1, %p61_p0  ;;  %p851_p5 = scmp.ge.s32.totalorder %s1188_s17, 1 }
   0xd   : > { %p1266_p6 = por %p147_p3, %p61_p0  ;;  %p154_p7 = scmp.lt.s32.totalorder %s1188_s17, 3 }
   0xe   : > { %s1517_s22 = scalar_select %p1261_p4, 1, 0 }
   0xf   : > { %s1518_s23 = scalar_select %p1266_p6, 1, 0 }
  0x10   : > { %p1271_p8 = pnand %p851_p5, %p154_p7  ;;  %s1190_s25 = smov [#allocation5]  }
  0x11   : > { %s172_s26 = sshll.u32 %s1190_s25, 4  ;;  %s39_s28 = sadd.s32 1, %s1184_s16  ;;  %s173_s26 = int_to_ptr.vmem [resolvable:$true] %s172_s26 }
  0x12   : > { %s1519_s24 = scalar_select %p1271_p8, 1, 0 }
  0x13   : > { %p975_p9 = pneg %p1271_p8  ;;  %s1044_s4 = scalar_lea.hbm %s1508_s1, 12288 }
  0x14   : > { %p1045_p12 = scmp.ne.s32.totalorder %s1508_s1, %s1044_s4  ;;  %p1051_p5 = scmp.lt.u32.totalorder %s1044_s4, %s1508_s1 }
  0x15   : > { %p1280_p11 = pnand %p975_p9, %p1251_p1 }
  0x17   : > { %p1046_p13 = pneg %p1280_p11 }
  0x19   : > { %p1047_p0 = pnand %p1046_p13, %p1045_p12 }
  0x1b   : > { %p1048_p3 = pneg %p1047_p0 }
  0x1d   : > { %p1053_p7 = pnand %p1051_p5, %p1048_p3 }
  0x1f   : > { %1056 = shalt.err (!%p1053_p7)
}
  0x20   : > { %s1057_s9 = scalar_lea.vmem %s173_s26, 12288  ;;  %p1065_p1 = scmp.lt.s32.totalorder %s173_s26, %s173_s26 }
  0x21   : > { %p1058_p9 = scmp.ne.s32.totalorder %s173_s26, %s1057_s9  ;;  %p1066_p4 = scmp.lt.s32.totalorder %s1057_s9, %s1057_s9 }
  0x23   : > { %p1060_p10 = pnand %p1058_p9, %p1046_p13  ;;  %p1067_p8 = por %p1066_p4, %p1065_p1 }
  0x25   : > { %p1061_p6 = pneg %p1060_p10 }
  0x27   : > { %p1068_p2 = pnand %p1067_p8, %p1061_p6 }
  0x29   : > { %1071 = shalt.err (!%p1068_p2)
}
  0x2a   : > { %s1191_s10 = smov 256   ;;  %s1192_s11 = smov 16  }
  0x2b   : > { %978 = dma.hbm_to_vmem [thread:$0]  (!%p1280_p11), %s1508_s1, 12288, %s173_s26, [#allocation6], %s1191_s10, %s1191_s10, %s1192_s11  }
  0x2c   : > { %p41_p1 = scmp.ge.s32.totalorder %s39_s28, 2  ;;  %s48_s25 = sadd.s32 1, %s1176_s14 }
  0x2d   : > { %p55_p2 = scmp.ne.s32.totalorder %s1176_s14, %s1172_s13  ;;  %p56_p4 = scmp.eq.s32.totalorder %s1188_s17, 0 }
  0x2e   : > { %s1536_s28 = smov (%p41_p1, %s39_s28), 0  ;;  %p1522_p8 = scmp.ne.s32.totalorder %s1516_s21, 0 }
  0x2f   : > { %p1310_p6 = por %p56_p4, %p55_p2  ;;  %s43_s30 = ssub.s32 %s1184_s16, %s1536_s28 }
  0x30   : > { %p1316_p10 = por %p1522_p8, %p55_p2  ;;  %p988_p12 = scmp.lt.s32.totalorder %s1188_s17, 2 }
  0x31   : > { %p46_p11 = scmp.eq.s32.totalorder %s43_s30, 0  ;;  %s194_s26 = sand.u32 1, %s1176_s14  }
  0x32   : > { %s855_s4 = sshll.u32 %s194_s26, 7  ;;  %s868_s6 = sshll.u32 %s1184_s16, 11 }
  0x33   : > { %s1325_s5 = scalar_select %p46_p11, %s1176_s14, %s48_s25  }
  0x34   : > { %s1331_s9 = scalar_lea.hbm %s1507_s0, %s868_s6  ;;  %s198_s21 = scalar_lea.vmem [#allocation2], %s855_s4 }
  0x35   : > { %s208_s18 = sshll.u32 %s198_s21, 4  ;;  %p1337_p13 = pnand %p988_p12, %p1310_p6  ;;  %s1333_s18 = int_to_ptr.vmem [resolvable:$true] %s208_s18 }
  0x36   : > { %s1341_s25 = scalar_lea.sflag [#allocation3], %s194_s26  ;;  %s1072_s30 = scalar_lea.hbm %s1331_s9, 2048 }
  0x37   : > { %p1073_p0 = scmp.ne.s32.totalorder %s1331_s9, %s1072_s30  ;;  %p1074_p3 = pneg %p1337_p13 }
  0x38   : > { %s1077_s29 = scalar_lea.hbm %s1507_s0, 4096  ;;  %p1078_p9 = scmp.lt.u32.totalorder %s1331_s9, %s1507_s0 }
  0x39   : > { %p1075_p5 = pnand %p1074_p3, %p1073_p0  ;;  %p1079_p1 = scmp.lt.u32.totalorder %s1077_s29, %s1072_s30 }
  0x3a   : > { %p1081_p4 = scmp.lt.u32.totalorder %s1072_s30, %s1331_s9 }
  0x3b   : > { %p1076_p7 = pneg %p1075_p5  ;;  %p1080_p2 = por %p1079_p1, %p1078_p9 }
  0x3d   : > { %p1082_p6 = por %p1081_p4, %p1080_p2 }
  0x3f   : > { %p1083_p8 = pnand %p1082_p6, %p1076_p7 }
  0x41   : > { %1086 = shalt.err (!%p1083_p8)
}
  0x42   : > { %s1087_s26 = scalar_lea.vmem %s1333_s18, 2048  ;;  %s1193_s21 = smov [#allocation2]  }
  0x43   : > { %p1088_p12 = scmp.ne.s32.totalorder %s1333_s18, %s1087_s26  ;;  %s1092_s4 = sshll.u32 %s1193_s21, 4  ;;  %s1093_s4 = int_to_ptr.vmem [resolvable:$false] %s1092_s4 }
  0x44   : > { %s1094_s6 = scalar_lea.vmem %s1093_s4, 4096  ;;  %p1095_p5 = scmp.lt.s32.totalorder %s1333_s18, %s1093_s4 }
  0x45   : > { %p1090_p11 = pnand %p1088_p12, %p1074_p3  ;;  %p1096_p9 = scmp.lt.s32.totalorder %s1094_s6, %s1087_s26 }
  0x47   : > { %p1091_p0 = pneg %p1090_p11  ;;  %p1097_p1 = por %p1096_p9, %p1095_p5 }
  0x49   : > { %p1098_p2 = pnand %p1097_p1, %p1091_p0 }
  0x4b   : > { %1101 = shalt.err (!%p1098_p2)
}
  0x4c   : > { %982 = dma.hbm_to_vmem [thread:$0]  (!%p1337_p13), %s1331_s9, 2048, %s1333_s18, %s1341_s25, %s1191_s10, %s1191_s10, %s1192_s11  }
  0x4d   : > { %p1525_p3 = scmp.ne.s32.totalorder %s1519_s24, 0 }
  0x4e   : > { %s1375_s30 = sand.u32 (!%p1525_p3), 1, %s1172_s13   ;;  %p1526_p7 = scmp.ne.s32.totalorder (!%p1525_p3), %s1517_s22, 0 }
  0x4f   : > { %220 = sbr.rel (%p1525_p3) target bundleno = 479 (0x1df), region = 32  ;;  %s860_s29 = sshll.u32 (!%p1525_p3), %s1375_s30, 7 }
  0x50   : > { %s223_s7 = scalar_lea.sflag (!%p1525_p3), [#allocation3], %s1375_s30  ;;  %s1379_s8 = scalar_lea.vmem (!%p1525_p3), [#allocation2], %s860_s29 }
  0x56   : > { %1155 = dma.done.wait (%p1526_p7), %s223_s7, 2048  }
  0x57   : > { %1157 = vsyncadd (%p1526_p7), %s223_s7, 4294965248  ;;  %p1527_p13 = scmp.ne.s32.totalorder %s1515_s20, 0 }
  0x59   : > { %1159 = dma.done.wait (%p1527_p13), [#allocation6], 12288  }
  0x5a   : > { %1161 = vsyncadd (%p1527_p13), [#allocation6], 4294955008  ;;  %v354_v0 = vld [vmem:[#allocation5 + $0x8] sm:$0xff]  ;;  %v356_v1 = vld [vmem:[#allocation5 + $0x18] sm:$0xff]  ;;  %s965_s24 = smul.u32 192, %s1375_s30  ;;  %s1194_s21 = smov [#allocation7]  }
  0x5b   : > { %v353_v2 = vld [vmem:[#allocation5] sm:$0xff]  ;;  %v869_v3 = vpack.c.bf16 %v356_v1, %v354_v0  ;;  %v355_v4 = vld [vmem:[#allocation5 + $0x10] sm:$0xff]  ;;  %v358_v5 = vld [vmem:[#allocation5 + $0x28] sm:$0xff]  ;;  %s966_s11 = smul.u32 3072, %s1180_s15  ;;  %s716_s15 = scalar_lea.sflag [#allocation4], %s1375_s30 }
  0x5c   : > { %v360_v6 = vld [vmem:[#allocation5 + $0x38] sm:$0xff]  ;;  %v871_v7 = vpack.c.bf16 %v355_v4, %v353_v2  ;;  %v357_v9 = vld [vmem:[#allocation5 + $0x20] sm:$0xff]  ;;  %v359_v10 = vld [vmem:[#allocation5 + $0x30] sm:$0xff]  ;;  %s1425_s10 = scalar_lea.vmem [#allocation7], %s965_s24  ;;  %s1106_s4 = sshll.u32 %s1194_s21, 4  ;;  %s1107_s4 = int_to_ptr.vmem [resolvable:$false] %s1106_s4 }
  0x5d   : > { %v873_v8 = vpack.c.bf16 %v360_v6, %v358_v5  ;;  %870 = vmatprep.subr.bf16.mxu0 %v869_v3  ;;  %v362_v11 = vld [vmem:[#allocation5 + $0x48] sm:$0xff]  ;;  %v364_v12 = vld [vmem:[#allocation5 + $0x58] sm:$0xff]  ;;  %v875_v13 = vpack.c.bf16 %v359_v10, %v357_v9  ;;  %v361_v17 = vld [vmem:[#allocation5 + $0x40] sm:$0xff]  ;;  %s732_s9 = sshll.u32 %s1425_s10, 4  ;;  %s1454_s25 = scalar_lea.hbm %s1510_s3, %s966_s11  ;;  %s1456_s9 = int_to_ptr.vmem [resolvable:$true] %s732_s9 }
  0x5e   : > { %872 = vmatpush1.bf16.xpose.msra.mxu0 %v871_v7  ;;  %v877_v14 = vpack.c.bf16 %v364_v12, %v362_v11  ;;  %v418_v15 = vld [vmem:[#allocation5 + $0x208] sm:$0xff]  ;;  %v420_v16 = vld [vmem:[#allocation5 + $0x218] sm:$0xff]  ;;  %v417_v19 = vld [vmem:[#allocation5 + $0x200] sm:$0xff]  ;;  %s1102_s26 = scalar_lea.vmem %s1456_s9, 3072  ;;  %s1108_s6 = scalar_lea.vmem %s1107_s4, 6144 }
  0x5f   : > { %874 = vmatprep.subr.bf16.mxu0 %v873_v8  ;;  %v933_v18 = vpack.c.bf16 %v420_v16, %v418_v15  ;;  %v363_v20 = vld [vmem:[#allocation5 + $0x50] sm:$0xff]  ;;  %v366_v21 = vld [vmem:[#allocation5 + $0x68] sm:$0xff]  ;;  %v368_v23 = vld [vmem:[#allocation5 + $0x78] sm:$0xff]  ;;  %p1103_p4 = scmp.ne.s32.totalorder %s1456_s9, %s1102_s26  ;;  %p1109_p12 = scmp.lt.s32.totalorder %s1456_s9, %s1107_s4 }
  0x60   : > { %v419_v22 = vld [vmem:[#allocation5 + $0x210] sm:$0xff]  ;;  %v422_v25 = vld [vmem:[#allocation5 + $0x228] sm:$0xff]  ;;  %v424_v26 = vld [vmem:[#allocation5 + $0x238] sm:$0xff]  ;;  %v879_v28 = vpack.c.bf16 %v363_v20, %v361_v17  ;;  %v881_v29 = vpack.c.bf16 %v368_v23, %v366_v21  ;;  %p1110_p11 = scmp.lt.s32.totalorder %s1108_s6, %s1102_s26 }
  0x61   : > { %934 = vmatprep.subr.bf16.mxu1 %v933_v18  ;;  %v935_v24 = vpack.c.bf16 %v419_v22, %v417_v19  ;;  %v937_v27 = vpack.c.bf16 %v424_v26, %v422_v25  ;;  %v421_v30 = vld [vmem:[#allocation5 + $0x220] sm:$0xff]  ;;  %v423_v31 = vld [vmem:[#allocation5 + $0x230] sm:$0xff]  ;;  %v426_v32 = vld [vmem:[#allocation5 + $0x248] sm:$0xff]  ;;  %p1104_p6 = pnand %p1103_p4, %p1316_p10 }
  0x62   : > { %v428_v33 = vld [vmem:[#allocation5 + $0x258] sm:$0xff]  ;;  %v939_v34 = vpack.c.bf16 %v423_v31, %v421_v30  ;;  %v365_v35 = vld [vmem:[#allocation5 + $0x60] sm:$0xff]  ;;  %v367_v36 = vld [vmem:[#allocation5 + $0x70] sm:$0xff]  ;;  %p1111_p0 = por %p1110_p11, %p1109_p12 }
  0x63   : > { %936 = vmatpush1.bf16.xpose.msra.mxu1 %v935_v24  ;;  %v941_v37 = vpack.c.bf16 %v428_v33, %v426_v32  ;;  %v370_v38 = vld [vmem:[#allocation5 + $0x88] sm:$0xff]  ;;  %v372_v39 = vld [vmem:[#allocation5 + $0x98] sm:$0xff]  ;;  %v883_v40 = vpack.c.bf16 %v367_v36, %v365_v35  ;;  %v425_v42 = vld [vmem:[#allocation5 + $0x240] sm:$0xff]  ;;  %p1105_p8 = pneg %p1104_p6 }
  0x64   : > { %938 = vmatprep.subr.bf16.mxu1 %v937_v27  ;;  %v885_v41 = vpack.c.bf16 %v372_v39, %v370_v38  ;;  %v427_v43 = vld [vmem:[#allocation5 + $0x250] sm:$0xff]  ;;  %v430_v44 = vld [vmem:[#allocation5 + $0x268] sm:$0xff]  ;;  %v432_v45 = vld [vmem:[#allocation5 + $0x278] sm:$0xff] }
  0x65   : > { %v943_v46 = vpack.c.bf16 %v427_v43, %v425_v42  ;;  %v369_v47 = vld [vmem:[#allocation5 + $0x80] sm:$0xff]  ;;  %v371_v48 = vld [vmem:[#allocation5 + $0x90] sm:$0xff]  ;;  %v945_v49 = vpack.c.bf16 %v432_v45, %v430_v44  ;;  %v374_v50 = vld [vmem:[#allocation5 + $0xa8] sm:$0xff]  ;;  %p1112_p5 = pnand %p1111_p0, %p1105_p8 }
  0x66   : > { %876 = vmatpush1.bf16.xpose.msra.mxu0 %v875_v13  ;;  %v376_v51 = vld [vmem:[#allocation5 + $0xb8] sm:$0xff]  ;;  %v887_v52 = vpack.c.bf16 %v371_v48, %v369_v47  ;;  %v338_v53 = vld [vmem:[%s1379_s8 + $0x8] sm:$0xff]  ;;  %v429_v55 = vld [vmem:[#allocation5 + $0x260] sm:$0xff] }
  0x67   : > { %878 = vmatprep.subr.bf16.mxu0 %v877_v14  ;;  %v889_v54 = vpack.c.bf16 %v376_v51, %v374_v50  ;;  %v431_v56 = vld [vmem:[#allocation5 + $0x270] sm:$0xff]  ;;  %513 = vmatprep.mubr.f32.mxu0 %v338_v53  ;;  %v434_v57 = vld [vmem:[#allocation5 + $0x288] sm:$0xff]  ;;  %v436_v58 = vld [vmem:[#allocation5 + $0x298] sm:$0xff] }
  0x68   : > { %626 = vmatprep.mubr.f32.mxu1 %v338_v53  ;;  %v947_v59 = vpack.c.bf16 %v431_v56, %v429_v55  ;;  %v373_v60 = vld [vmem:[#allocation5 + $0xa0] sm:$0xff]  ;;  %v375_v61 = vld [vmem:[#allocation5 + $0xb0] sm:$0xff]  ;;  %v949_v62 = vpack.c.bf16 %v436_v58, %v434_v57  ;;  %v378_v63 = vld [vmem:[#allocation5 + $0xc8] sm:$0xff] }
  0x69   : > { %v380_v0 = vld [vmem:[#allocation5 + $0xd8] sm:$0xff]  ;;  %v891_v1 = vpack.c.bf16 %v375_v61, %v373_v60  ;;  %v433_v3 = vld [vmem:[#allocation5 + $0x280] sm:$0xff]  ;;  %v435_v4 = vld [vmem:[#allocation5 + $0x290] sm:$0xff] }
  0x6a   : > { %v893_v2 = vpack.c.bf16 %v380_v0, %v378_v63  ;;  %v438_v5 = vld [vmem:[#allocation5 + $0x2a8] sm:$0xff]  ;;  %v440_v6 = vld [vmem:[#allocation5 + $0x2b8] sm:$0xff]  ;;  %v951_v7 = vpack.c.bf16 %v435_v4, %v433_v3  ;;  %v377_v8 = vld [vmem:[#allocation5 + $0xc0] sm:$0xff] }
  0x6b   : > { %940 = vmatpush1.bf16.xpose.msra.mxu1 %v939_v34  ;;  %v379_v9 = vld [vmem:[#allocation5 + $0xd0] sm:$0xff]  ;;  %v953_v10 = vpack.c.bf16 %v440_v6, %v438_v5  ;;  %v382_v11 = vld [vmem:[#allocation5 + $0xe8] sm:$0xff]  ;;  %v384_v12 = vld [vmem:[#allocation5 + $0xf8] sm:$0xff] }
  0x6c   : > { %942 = vmatprep.subr.bf16.mxu1 %v941_v37  ;;  %v895_v13 = vpack.c.bf16 %v379_v9, %v377_v8  ;;  %v897_v14 = vpack.c.bf16 %v384_v12, %v382_v11  ;;  %v437_v15 = vld [vmem:[#allocation5 + $0x2a0] sm:$0xff]  ;;  %v439_v16 = vld [vmem:[#allocation5 + $0x2b0] sm:$0xff]  ;;  %v442_v17 = vld [vmem:[#allocation5 + $0x2c8] sm:$0xff] }
  0x6d   : > { %v444_v18 = vld [vmem:[#allocation5 + $0x2d8] sm:$0xff]  ;;  %v955_v19 = vpack.c.bf16 %v439_v16, %v437_v15  ;;  %v381_v20 = vld [vmem:[#allocation5 + $0xe0] sm:$0xff]  ;;  %v383_v21 = vld [vmem:[#allocation5 + $0xf0] sm:$0xff] }
  0x6e   : > { %880 = vmatpush1.bf16.xpose.msra.mxu0 %v879_v28  ;;  %v957_v22 = vpack.c.bf16 %v444_v18, %v442_v17  ;;  %v386_v23 = vld [vmem:[#allocation5 + $0x108] sm:$0xff]  ;;  %v388_v24 = vld [vmem:[#allocation5 + $0x118] sm:$0xff]  ;;  %v899_v25 = vpack.c.bf16 %v383_v21, %v381_v20  ;;  %v441_v27 = vld [vmem:[#allocation5 + $0x2c0] sm:$0xff] }
  0x6f   : > { %882 = vmatprep.subr.bf16.mxu0 %v881_v29  ;;  %v901_v26 = vpack.c.bf16 %v388_v24, %v386_v23  ;;  %v443_v28 = vld [vmem:[#allocation5 + $0x2d0] sm:$0xff]  ;;  %v446_v29 = vld [vmem:[#allocation5 + $0x2e8] sm:$0xff]  ;;  %v448_v30 = vld [vmem:[#allocation5 + $0x2f8] sm:$0xff] }
  0x70   : > { %v959_v31 = vpack.c.bf16 %v443_v28, %v441_v27  ;;  %v385_v32 = vld [vmem:[#allocation5 + $0x100] sm:$0xff]  ;;  %v387_v33 = vld [vmem:[#allocation5 + $0x110] sm:$0xff]  ;;  %v961_v34 = vpack.c.bf16 %v448_v30, %v446_v29  ;;  %v390_v35 = vld [vmem:[#allocation5 + $0x128] sm:$0xff] }
  0x71   : > { %v392_v36 = vld [vmem:[#allocation5 + $0x138] sm:$0xff]  ;;  %v903_v37 = vpack.c.bf16 %v387_v33, %v385_v32  ;;  %v445_v39 = vld [vmem:[#allocation5 + $0x2e0] sm:$0xff]  ;;  %v391_v43 = vld [vmem:[#allocation5 + $0x130] sm:$0xff]  ;;  %v274_v32 = vlaneseq }
  0x72   : > { %v905_v38 = vpack.c.bf16 %v392_v36, %v390_v35  ;;  %v389_v42 = vld [vmem:[#allocation5 + $0x120] sm:$0xff]  ;;  %v394_v44 = vld [vmem:[#allocation5 + $0x148] sm:$0xff]  ;;  %v396_v45 = vld [vmem:[#allocation5 + $0x158] sm:$0xff] }
  0x73   : > { %944 = vmatpush1.bf16.xpose.msra.mxu1 %v943_v46  ;;  %v907_v46 = vpack.c.bf16 %v391_v43, %v389_v42  ;;  %v909_v47 = vpack.c.bf16 %v396_v45, %v394_v44  ;;  %v1391_v48 = vld [vmem:[%s1379_s8] sm:$0xff]  ;;  %v395_v50 = vld [vmem:[#allocation5 + $0x150] sm:$0xff]  ;;  %v1394_v51 = vld [vmem:[%s1379_s8 + $0x18] sm:$0xff]  ;;  %v275_v33 = vshrl.u32 %v274_v32, 7 }
  0x74   : > { %946 = vmatprep.subr.bf16.mxu1 %v945_v49  ;;  %v393_v49 = vld [vmem:[#allocation5 + $0x140] sm:$0xff]  ;;  %v400_v53 = vld [vmem:[#allocation5 + $0x178] sm:$0xff]  ;;  %v1399_v55 = vld [vmem:[%s1379_s8 + $0x10] sm:$0xff] }
  0x75   : > { %v1402_v57 = vld [vmem:[%s1379_s8 + $0x28] sm:$0xff]  ;;  %v341_v58 = vld [vmem:[%s1379_s8 + $0x20] sm:$0xff]  ;;  %v399_v60 = vld [vmem:[#allocation5 + $0x170] sm:$0xff] }
  0x76   : > { %884 = vmatpush1.bf16.xpose.msra.mxu0 %v883_v40  ;;  %v447_v40 = vld [vmem:[#allocation5 + $0x2f0] sm:$0xff]  ;;  %v344_v61 = vld [vmem:[%s1379_s8 + $0x38] sm:$0xff]  ;;  %v346_v3 = vld [vmem:[%s1379_s8 + $0x48] sm:$0xff] }
  0x77   : > { %886 = vmatprep.subr.bf16.mxu0 %v885_v41  ;;  %v963_v41 = vpack.c.bf16 %v447_v40, %v445_v39  ;;  %v404_v63 = vld [vmem:[#allocation5 + $0x198] sm:$0xff]  ;;  %v345_v4 = vld [vmem:[%s1379_s8 + $0x40] sm:$0xff]  ;;  %v403_v6 = vld [vmem:[#allocation5 + $0x190] sm:$0xff] }
  0x78   : > { %v401_v5 = vld [vmem:[#allocation5 + $0x180] sm:$0xff]  ;;  %v406_v8 = vld [vmem:[#allocation5 + $0x1a8] sm:$0xff]  ;;  %v408_v9 = vld [vmem:[#allocation5 + $0x1b8] sm:$0xff] }
  0x79   : > { %v347_v11 = vld [vmem:[%s1379_s8 + $0x50] sm:$0xff]  ;;  %v921_v12 = vpack.c.bf16 %v408_v9, %v406_v8  ;;  %v405_v15 = vld [vmem:[#allocation5 + $0x1a0] sm:$0xff]  ;;  %v352_v17 = vld [vmem:[%s1379_s8 + $0x78] sm:$0xff] }
  0x7a   : > { %v407_v16 = vld [vmem:[#allocation5 + $0x1b0] sm:$0xff]  ;;  %v410_v18 = vld [vmem:[#allocation5 + $0x1c8] sm:$0xff]  ;;  %v409_v23 = vld [vmem:[#allocation5 + $0x1c0] sm:$0xff] }
  0x7b   : > { %948 = vmatpush1.bf16.xpose.msra.mxu1 %v947_v59  ;;  %v397_v59 = vld [vmem:[#allocation5 + $0x160] sm:$0xff]  ;;  %v923_v20 = vpack.c.bf16 %v407_v16, %v405_v15  ;;  %v351_v21 = vld [vmem:[%s1379_s8 + $0x70] sm:$0xff] }
  0x7c   : > { %950 = vmatprep.subr.bf16.mxu1 %v949_v62  ;;  %v402_v62 = vld [vmem:[#allocation5 + $0x188] sm:$0xff]  ;;  %v915_v0 = vpack.c.bf16 %v399_v60, %v397_v59  ;;  %v411_v24 = vld [vmem:[#allocation5 + $0x1d0] sm:$0xff]  ;;  %v413_v29 = vld [vmem:[#allocation5 + $0x1e0] sm:$0xff] }
  0x7d   : > { %v927_v27 = vpack.c.bf16 %v411_v24, %v409_v23  ;;  %v415_v30 = vld [vmem:[#allocation5 + $0x1f0] sm:$0xff]  ;;  %v272_v35 = vld [vmem:[%s1509_s2] sm:$0x7] }
  0x7e   : > { %888 = vmatpush1.bf16.xpose.msra.mxu0 %v887_v52  ;;  %v398_v52 = vld [vmem:[#allocation5 + $0x168] sm:$0xff] }
  0x7f   : > { %890 = vmatprep.subr.bf16.mxu0 %v889_v54  ;;  %v911_v54 = vpack.c.bf16 %v395_v50, %v393_v49  ;;  %v913_v56 = vpack.c.bf16 %v400_v53, %v398_v52 }
  0x83   : > { %952 = vmatpush1.bf16.xpose.msra.mxu1 %v951_v7  ;;  %v348_v7 = vld [vmem:[%s1379_s8 + $0x58] sm:$0xff] }
  0x84   : > { %954 = vmatprep.subr.bf16.mxu1 %v953_v10  ;;  %v919_v10 = vpack.c.bf16 %v403_v6, %v401_v5 }
  0x86   : > { %892 = vmatpush1.bf16.xpose.msra.mxu0 %v891_v1  ;;  %v343_v1 = vld [vmem:[%s1379_s8 + $0x30] sm:$0xff] }
  0x87   : > { %894 = vmatprep.subr.bf16.mxu0 %v893_v2  ;;  %v917_v2 = vpack.c.bf16 %v404_v63, %v402_v62  ;;  %v280_v62 = vsub.s32 1, %v275_v33 }
  0x8b   : > { %956 = vmatpush1.bf16.xpose.msra.mxu1 %v955_v19  ;;  %v412_v19 = vld [vmem:[#allocation5 + $0x1d8] sm:$0xff] }
  0x8c   : > { %958 = vmatprep.subr.bf16.mxu1 %v957_v22  ;;  %v925_v22 = vpack.c.bf16 %v412_v19, %v410_v18 }
  0x8e   : > { %896 = vmatpush1.bf16.xpose.msra.mxu0 %v895_v13  ;;  %v350_v13 = vld [vmem:[%s1379_s8 + $0x68] sm:$0xff] }
  0x8f   : > { %898 = vmatprep.subr.bf16.mxu0 %v897_v14  ;;  %v349_v14 = vld [vmem:[%s1379_s8 + $0x60] sm:$0xff] }
  0x93   : > { %960 = vmatpush1.bf16.xpose.msra.mxu1 %v959_v31  ;;  %v931_v31 = vpack.c.bf16 %v415_v30, %v413_v29 }
  0x94   : > { %962 = vmatprep.subr.bf16.mxu1 %v961_v34  ;;  %v284_v34 = vsub.s32 2, %v275_v33 }
  0x96   : > { %900 = vmatpush1.bf16.xpose.msra.mxu0 %v899_v25  ;;  %v414_v25 = vld [vmem:[#allocation5 + $0x1e8] sm:$0xff]  ;;  %v285_v36 = vrot.slane %v272_v35, %v284_v34 }
  0x97   : > { %902 = vmatprep.subr.bf16.mxu0 %v901_v26  ;;  %v416_v26 = vld [vmem:[#allocation5 + $0x1f8] sm:$0xff] }
  0x98   : > { %v929_v28 = vpack.c.bf16 %v416_v26, %v414_v25 }
  0x9b   : > { %964 = vmatpush1.bf16.xpose.msra.mxu1 %v963_v41 }
  0x9e   : > { %904 = vmatpush1.bf16.xpose.msra.mxu0 %v903_v37 }
  0x9f   : > { %906 = vmatprep.subr.bf16.mxu0 %v905_v38 }
  0xa2   : > { %627 = vmatmul.mubr.f32.vlgmr.msra.gmra.mrb[0].mxu1 %v1391_v48 }
  0xa3   : > { %631 = vmatprep.mubr.f32.mxu1 %v1394_v51 }
  0xa6   : > { %908 = vmatpush1.bf16.xpose.msra.mxu0 %v907_v46  ;;  %632 = vmatmul.mubr.f32.gmra.mrb[2].mxu1 %v1399_v55 }
  0xa7   : > { %910 = vmatprep.subr.bf16.mxu0 %v909_v47  ;;  %636 = vmatprep.mubr.f32.mxu1 %v1402_v57 }
  0xaa   : > { %637 = vmatmul.mubr.f32.gmra.mrb[4].mxu1 %v341_v58 }
  0xab   : > { %641 = vmatprep.mubr.f32.mxu1 %v344_v61 }
  0xae   : > { %912 = vmatpush1.bf16.xpose.msra.mxu0 %v911_v54  ;;  %642 = vmatmul.mubr.f32.gmra.mrb[6].mxu1 %v343_v1 }
  0xaf   : > { %914 = vmatprep.subr.bf16.mxu0 %v913_v56  ;;  %646 = vmatprep.mubr.f32.mxu1 %v346_v3 }
  0xb2   : > { %647 = vmatmul.mubr.f32.gmra.mrb[8].mxu1 %v345_v4 }
  0xb3   : > { %651 = vmatprep.mubr.f32.mxu1 %v348_v7 }
  0xb6   : > { %916 = vmatpush1.bf16.xpose.msra.mxu0 %v915_v0  ;;  %652 = vmatmul.mubr.f32.gmra.mrb[10].mxu1 %v347_v11  ;;  %v281_v0 = vrot.slane %v272_v35, %v280_v62 }
  0xb7   : > { %918 = vmatprep.subr.bf16.mxu0 %v917_v2  ;;  %656 = vmatprep.mubr.f32.mxu1 %v350_v13 }
  0xba   : > { %657 = vmatmul.mubr.f32.gmra.mrb[12].mxu1 %v349_v14 }
  0xbb   : > { %661 = vmatprep.mubr.f32.mxu1 %v352_v17 }
  0xbe   : > { %920 = vmatpush1.bf16.xpose.msra.mxu0 %v919_v10  ;;  %662 = vmatmul.mubr.f32.gmra.mrb[14].mxu1 %v351_v21 }
  0xbf   : > { %922 = vmatprep.subr.bf16.mxu0 %v921_v12 }
  0xc6   : > { %924 = vmatpush1.bf16.xpose.msra.mxu0 %v923_v20 }
  0xc7   : > { %926 = vmatprep.subr.bf16.mxu0 %v925_v22 }
  0xce   : > { %928 = vmatpush1.bf16.xpose.msra.mxu0 %v927_v27 }
  0xcf   : > { %930 = vmatprep.subr.bf16.mxu0 %v929_v28 }
  0xd6   : > { %932 = vmatpush1.bf16.xpose.msra.mxu0 %v931_v31 }
  0xdd   : > { %514 = vmatmul.mubr.f32.vlgmr.msra.gmra.mrb[0].mxu0 %v1391_v48 }
  0xde   : > { %519 = vmatprep.mubr.f32.mxu0 %v1394_v51 }
  0xe1   : > { %520 = vmatmul.mubr.f32.gmra.mrb[2].mxu0 %v1399_v55 }
  0xe2   : > { %525 = vmatprep.mubr.f32.mxu0 %v1402_v57 }
  0xe5   : > { %526 = vmatmul.mubr.f32.gmra.mrb[4].mxu0 %v341_v58 }
  0xe6   : > { %531 = vmatprep.mubr.f32.mxu0 %v344_v61  ;;  %v276_v61 = vsub.s32 0, %v275_v33 }
  0xe8   : > { %v277_v63 = vrot.slane %v272_v35, %v276_v61 }
  0xe9   : > { %532 = vmatmul.mubr.f32.gmra.mrb[6].mxu0 %v343_v1 }
  0xea   : > { %537 = vmatprep.mubr.f32.mxu0 %v346_v3 }
  0xed   : > { %538 = vmatmul.mubr.f32.gmra.mrb[8].mxu0 %v345_v4 }
  0xee   : > { %543 = vmatprep.mubr.f32.mxu0 %v348_v7 }
  0xf1   : > { %544 = vmatmul.mubr.f32.gmra.mrb[10].mxu0 %v347_v11 }
  0xf2   : > { %549 = vmatprep.mubr.f32.mxu0 %v350_v13 }
  0xf5   : > { %550 = vmatmul.mubr.f32.gmra.mrb[12].mxu0 %v349_v14 }
  0xf6   : > { %555 = vmatprep.mubr.f32.mxu0 %v352_v17 }
  0xf9   : > { %556 = vmatmul.mubr.f32.gmra.mrb[14].mxu0 %v351_v21 }
 0x175   : > { %v628_v37 = vpop.f32.mrb[0].mxu1 }
 0x176   : > { %v669_v38 = vadd.f32 %v628_v37, %v285_v36  ;;  %v630_v39 = vpop.f32.mrb[1].mxu1 }
 0x178   : > { %693 = vst [vmem:[%s1425_s10 + $0x10] sm:$0xff] %v669_v38 }
 0x179   : > { %v633_v40 = vpop.f32.mrb[2].mxu1 }
 0x17a   : > { %v672_v41 = vadd.f32 %v633_v40, %v285_v36  ;;  %v635_v42 = vpop.f32.mrb[3].mxu1 }
 0x17c   : > { %696 = vst [vmem:[%s1425_s10 + $0x28] sm:$0xff] %v672_v41 }
 0x17d   : > { %v638_v43 = vpop.f32.mrb[4].mxu1 }
 0x17e   : > { %v675_v44 = vadd.f32 %v638_v43, %v285_v36  ;;  %v640_v45 = vpop.f32.mrb[5].mxu1 }
 0x180   : > { %699 = vst [vmem:[%s1425_s10 + $0x40] sm:$0xff] %v675_v44 }
 0x181   : > { %v643_v46 = vpop.f32.mrb[6].mxu1 }
 0x182   : > { %v678_v47 = vadd.f32 %v643_v46, %v285_v36  ;;  %v645_v48 = vpop.f32.mrb[7].mxu1 }
 0x184   : > { %702 = vst [vmem:[%s1425_s10 + $0x58] sm:$0xff] %v678_v47 }
 0x185   : > { %v648_v49 = vpop.f32.mrb[8].mxu1 }
 0x186   : > { %v681_v50 = vadd.f32 %v648_v49, %v285_v36  ;;  %v650_v51 = vpop.f32.mrb[9].mxu1 }
 0x188   : > { %705 = vst [vmem:[%s1425_s10 + $0x70] sm:$0xff] %v681_v50 }
 0x189   : > { %v653_v52 = vpop.f32.mrb[10].mxu1 }
 0x18a   : > { %v684_v53 = vadd.f32 %v653_v52, %v285_v36  ;;  %v655_v54 = vpop.f32.mrb[11].mxu1 }
 0x18c   : > { %708 = vst [vmem:[%s1425_s10 + $0x88] sm:$0xff] %v684_v53 }
 0x18d   : > { %v658_v55 = vpop.f32.mrb[12].mxu1 }
 0x18e   : > { %v687_v56 = vadd.f32 %v658_v55, %v285_v36  ;;  %v660_v57 = vpop.f32.mrb[13].mxu1 }
 0x190   : > { %711 = vst [vmem:[%s1425_s10 + $0xa0] sm:$0xff] %v687_v56 }
 0x191   : > { %v663_v58 = vpop.f32.mrb[14].mxu1 }
 0x192   : > { %v690_v59 = vadd.f32 %v663_v58, %v285_v36  ;;  %v665_v60 = vpop.f32.mrb[15].mxu1 }
 0x194   : > { %714 = vst [vmem:[%s1425_s10 + $0xb8] sm:$0xff] %v690_v59 }
 0x1b0   : > { %v515_v1 = vpop.f32.mrb[0].mxu0 }
 0x1b1   : > { %v667_v2 = vadd.f32 %v515_v1, %v277_v63  ;;  %v517_v3 = vpop.f32.mrb[1].mxu0 }
 0x1b2   : > { %v668_v4 = vadd.f32 %v517_v3, %v281_v0 }
 0x1b3   : > { %691 = vst [vmem:[%s1425_s10] sm:$0xff] %v667_v2 }
 0x1b4   : > { %692 = vst [vmem:[%s1425_s10 + $0x8] sm:$0xff] %v668_v4  ;;  %v521_v5 = vpop.f32.mrb[2].mxu0 }
 0x1b5   : > { %v670_v6 = vadd.f32 %v521_v5, %v277_v63  ;;  %v523_v7 = vpop.f32.mrb[3].mxu0 }
 0x1b6   : > { %v671_v8 = vadd.f32 %v523_v7, %v281_v0 }
 0x1b7   : > { %694 = vst [vmem:[%s1425_s10 + $0x18] sm:$0xff] %v670_v6 }
 0x1b8   : > { %695 = vst [vmem:[%s1425_s10 + $0x20] sm:$0xff] %v671_v8  ;;  %v527_v9 = vpop.f32.mrb[4].mxu0 }
 0x1b9   : > { %v673_v10 = vadd.f32 %v527_v9, %v277_v63  ;;  %v529_v11 = vpop.f32.mrb[5].mxu0 }
 0x1ba   : > { %v674_v12 = vadd.f32 %v529_v11, %v281_v0 }
 0x1bb   : > { %697 = vst [vmem:[%s1425_s10 + $0x30] sm:$0xff] %v673_v10 }
 0x1bc   : > { %698 = vst [vmem:[%s1425_s10 + $0x38] sm:$0xff] %v674_v12  ;;  %v533_v13 = vpop.f32.mrb[6].mxu0 }
 0x1bd   : > { %v676_v14 = vadd.f32 %v533_v13, %v277_v63  ;;  %v535_v15 = vpop.f32.mrb[7].mxu0 }
 0x1be   : > { %v677_v16 = vadd.f32 %v535_v15, %v281_v0 }
 0x1bf   : > { %700 = vst [vmem:[%s1425_s10 + $0x48] sm:$0xff] %v676_v14 }
 0x1c0   : > { %701 = vst [vmem:[%s1425_s10 + $0x50] sm:$0xff] %v677_v16  ;;  %v539_v17 = vpop.f32.mrb[8].mxu0 }
 0x1c1   : > { %v679_v18 = vadd.f32 %v539_v17, %v277_v63  ;;  %v541_v19 = vpop.f32.mrb[9].mxu0 }
 0x1c2   : > { %v680_v20 = vadd.f32 %v541_v19, %v281_v0 }
 0x1c3   : > { %703 = vst [vmem:[%s1425_s10 + $0x60] sm:$0xff] %v679_v18 }
 0x1c4   : > { %704 = vst [vmem:[%s1425_s10 + $0x68] sm:$0xff] %v680_v20  ;;  %v545_v21 = vpop.f32.mrb[10].mxu0 }
 0x1c5   : > { %v682_v22 = vadd.f32 %v545_v21, %v277_v63  ;;  %v547_v23 = vpop.f32.mrb[11].mxu0 }
 0x1c6   : > { %v683_v24 = vadd.f32 %v547_v23, %v281_v0 }
 0x1c7   : > { %706 = vst [vmem:[%s1425_s10 + $0x78] sm:$0xff] %v682_v22 }
 0x1c8   : > { %707 = vst [vmem:[%s1425_s10 + $0x80] sm:$0xff] %v683_v24  ;;  %v551_v25 = vpop.f32.mrb[12].mxu0 }
 0x1c9   : > { %v685_v26 = vadd.f32 %v551_v25, %v277_v63  ;;  %v553_v27 = vpop.f32.mrb[13].mxu0 }
 0x1ca   : > { %v686_v28 = vadd.f32 %v553_v27, %v281_v0 }
 0x1cb   : > { %709 = vst [vmem:[%s1425_s10 + $0x90] sm:$0xff] %v685_v26 }
 0x1cc   : > { %710 = vst [vmem:[%s1425_s10 + $0x98] sm:$0xff] %v686_v28  ;;  %v557_v29 = vpop.f32.mrb[14].mxu0 }
 0x1cd   : > { %v688_v30 = vadd.f32 %v557_v29, %v277_v63  ;;  %v559_v31 = vpop.f32.mrb[15].mxu0 }
 0x1ce   : > { %v689_v32 = vadd.f32 %v559_v31, %v281_v0 }
 0x1cf   : > { %712 = vst [vmem:[%s1425_s10 + $0xa8] sm:$0xff] %v688_v30 }
 0x1d0   : > { %713 = vst [vmem:[%s1425_s10 + $0xb0] sm:$0xff] %v689_v32 }
 0x1d1   : > { %1115 = shalt.err (!%p1112_p5)
}
 0x1d2   : > { %s1116_s29 = scalar_lea.hbm %s1454_s25, 3072  ;;  %s1120_s20 = scalar_lea.hbm %s1510_s3, 6144 }
 0x1d3   : > { %p1117_p9 = scmp.ne.s32.totalorder %s1454_s25, %s1116_s29  ;;  %p1121_p3 = scmp.lt.u32.totalorder %s1454_s25, %s1510_s3 }
 0x1d4   : > { %p1122_p7 = scmp.lt.u32.totalorder %s1120_s20, %s1116_s29  ;;  %p1124_p4 = scmp.lt.u32.totalorder %s1116_s29, %s1454_s25 }
 0x1d5   : > { %p1118_p1 = pnand %p1117_p9, %p1316_p10 }
 0x1d6   : > { %p1123_p13 = por %p1122_p7, %p1121_p3 }
 0x1d7   : > { %p1119_p2 = pneg %p1118_p1 }
 0x1d8   : > { %p1125_p6 = por %p1124_p4, %p1123_p13 }
 0x1da   : > { %p1126_p8 = pnand %p1125_p6, %p1119_p2 }
 0x1dc   : > { %1129 = shalt.err (!%p1126_p8)
}
 0x1dd   : > { %s1195_s10 = smov 384   ;;  %s1196_s11 = smov 24  }
 0x1de   : > { %973 = dma.vmem_to_hbm [thread:$0]  (%p1316_p10), %s1456_s9, 3072, %s1454_s25, %s716_s15, %s1195_s10, %s1195_s10, %s1196_s11  }
 0x1df PF: > { %s747_s18 = sand.u32 1, %s1168_s12   ;;  %p1528_p12 = scmp.ne.s32.totalorder %s1518_s23, 0 }
 0x1e0   : > { %p1529_p11 = scmp.ge.s32.totalorder %s1188_s17, 2  ;;  %s748_s19 = scalar_lea.sflag [#allocation4], %s747_s18 }
 0x1e2   : > { %p984_p0 = pnand %p1529_p11, %p1528_p12 }
 0x1e4   : > { %1163 = dma.done.wait (!%p984_p0), %s748_s19, 3072  }
 0x1e5   : > { %1165 = vsyncadd (!%p984_p0), %s748_s19, 4294964224  ;;  %s20_s17 = sadd.s32 1, %s1188_s17   ;;  %s1530_s12 = smov %s1172_s13 }
 0x1e6   : > { %p17_p5 = scmp.ge.s32.totalorder %s20_s17, 4   ;;  %s1531_s13 = smov %s1176_s14 }
 0x1e7   : > { %s1532_s14 = smov %s1325_s5  ;;  %s1533_s15 = smov %s1184_s16 }
 0x1e8   : > { %s1534_s16 = smov %s1536_s28  ;;  %19 = sbr.rel (!%p17_p5) target bundleno = 7 (0x7), region = 89 }
 0x1ef   :  { %753 = vsyncpa [#allocation3], 1 }
 0x1f0   :  { %755 = vsyncpa [#allocation3 + $0x1], 1 }
 0x1f1   :  { %756 = vsyncpa [#allocation6], 1 }
 0x1f2   :  { %757 = vsyncpa [#allocation4], 1 }
 0x1f3   :  { %759 = vsyncpa [#allocation4 + $0x1], 1 }

</bundles_post_ra>
